<compile_context>
chip_gen: v6e
topology: v6e:2x2x1
jax: 0.10.0
libtpu: 0.0.40
codegen_flags: <defaults>
</compile_context>

<pallas_src>
import functools

import jax
import jax.numpy as jnp
from jax.experimental import pallas as pl
from jax.experimental.pallas import tpu as pltpu

N_FEATURES = 4
N_LAYERS = 10
SUB = 8          # sublane-padded feature width (max layer width is 8)
LANE = 128       # lane width: batch tiles are multiples of this

# (fan_in, fan_out) of each Linear, in forward order.
LAYER_DIMS = [
    (N_FEATURES, 8), (8, 6), (6, 4), (4, 3), (3, 2),   # encoder  en1..en5
    (2, 3), (3, 4), (4, 6), (6, 8), (8, N_FEATURES),   # decoder  de1..de5
]
LAYER_NAMES = ["en1", "en2", "en3", "en4", "en5",
               "de1", "de2", "de3", "de4", "de5"]


def _round_up(a, m):
    return ((a + m - 1) // m) * m


def _cdiv(a, m):
    return (a + m - 1) // m


def _ae_kernel(x_ref, w_ref, b_ref, o_ref):
    # x_ref: (SUB, TB) f32  -- rows 0:4 = features (batch on lanes), rows 4:8 = 0
    # w_ref: (10, SUB, SUB) bf16, W[l] stored as (fout, fin), zero padded
    # b_ref: (10, SUB, 1)  f32, zero padded
    # o_ref: (N_FEATURES, TB) f32
    h = x_ref[...]                                       # (8, TB) f32
    for l in range(N_LAYERS):
        # bf16 MXU inputs, f32 accumulation; bias added in f32.
        a = jnp.dot(w_ref[l], h.astype(jnp.bfloat16),
                    preferred_element_type=jnp.float32) + b_ref[l]
        # tanh follows every layer except the last (decode applies tanh to the
        # latent z before de1, so en5 is effectively tanh'd too).
        h = jnp.tanh(a) if l < N_LAYERS - 1 else a
    o_ref[...] = h[0:N_FEATURES, :].astype(o_ref.dtype)  # lane-dense store


def pack_params(params):
    """Pack per-layer (weight, bias) into tiny zero-padded stacks (done ONCE).

    PyTorch nn.Linear stores weight as (out, in); the kernel computes W @ h with
    h laid out (features, batch), so weights are stored (fout, fin) directly.
    Weights are bf16 (MXU-native); biases stay f32 (added post-accumulation).
    """
    w_stack = jnp.zeros((N_LAYERS, SUB, SUB), jnp.float32)
    b_stack = jnp.zeros((N_LAYERS, SUB, 1), jnp.float32)
    for l, name in enumerate(LAYER_NAMES):
        w, b = params[name]
        fin, fout = LAYER_DIMS[l]
        w_stack = w_stack.at[l, :fout, :fin].set(jnp.asarray(w, jnp.float32))
        b_stack = b_stack.at[l, :fout, 0].set(jnp.asarray(b, jnp.float32))
    return w_stack.astype(jnp.bfloat16), b_stack


@functools.partial(jax.jit, static_argnames=("tb",))
def ae_big_2d_v2_forward(x, w_stack, b_stack, *, tb=512):
    """x: (B, 4) float32.  w_stack: (10,8,8) bf16.  b_stack: (10,8,1) f32."""
    B, nf = x.shape
    assert nf == N_FEATURES

    # Batch tile: lane(128)-aligned; prefer >= 2 grid steps when the batch allows
    # it so ("parallel",) can shard the grid across v7x's two TensorCores.
    bp_min = _round_up(B, LANE)
    tb_eff = min(_round_up(tb, LANE), bp_min)
    if bp_min > LANE:
        tb_eff = min(tb_eff, _round_up(_cdiv(bp_min, 2), LANE))
    Bp = _round_up(B, tb_eff)

    # Batch-on-lanes input slab: (8, Bp); rows 0:4 = x.T, rest zeros.  Single
    # fused XLA pad/transpose; no in-kernel scratch zero-fill needed.
    x_slab = jnp.pad(x.astype(jnp.float32).T,
                     ((0, SUB - N_FEATURES), (0, Bp - B)))

    grid = (Bp // tb_eff,)
    x_spec = pl.BlockSpec((SUB, tb_eff), lambda i: (0, i))
    w_spec = pl.BlockSpec((N_LAYERS, SUB, SUB), lambda i: (0, 0, 0))
    b_spec = pl.BlockSpec((N_LAYERS, SUB, 1), lambda i: (0, 0, 0))
    o_spec = pl.BlockSpec((N_FEATURES, tb_eff), lambda i: (0, i))

    out_slab = pl.pallas_call(
        _ae_kernel,
        out_shape=jax.ShapeDtypeStruct((N_FEATURES, Bp), jnp.float32),
        grid_spec=pltpu.PrefetchScalarGridSpec(
            num_scalar_prefetch=0,
            grid=grid,
            in_specs=[x_spec, w_spec, b_spec],
            out_specs=o_spec,
        ),
        compiler_params=pltpu.CompilerParams(
            dimension_semantics=("parallel",)),
    )(x_slab, w_stack, b_stack)

    return out_slab[:, :B].T


def init_params(key):
    """Deterministic init mimicking PyTorch nn.Linear default (uniform +-1/sqrt(fan_in))."""
    params = {}
    for name, (fin, fout) in zip(LAYER_NAMES, LAYER_DIMS):
        key, kw, kb = jax.random.split(key, 3)
        bound = 1.0 / jnp.sqrt(fin)
        w = jax.random.uniform(kw, (fout, fin), jnp.float32, -bound, bound)
        b = jax.random.uniform(kb, (fout,), jnp.float32, -bound, bound)
        params[name] = (w, b)
    return params


def reference_forward(x, params):
    """Pure-JAX (f32) reference of the PyTorch AE_big_2D_v2.forward."""
    def lin(h, name):
        w, b = params[name]
        return h @ w.T + b

    h = x
    for name in ["en1", "en2", "en3", "en4"]:
        h = jnp.tanh(lin(h, name))
    z = lin(h, "en5")
    h = jnp.tanh(z)
    for name in ["de1", "de2", "de3", "de4"]:
        h = jnp.tanh(lin(h, name))
    return lin(h, "de5")


if __name__ == "__main__":
    key = jax.random.PRNGKey(0)
    kx, kp = jax.random.split(key)
    params = init_params(kp)
    w_stack, b_stack = pack_params(params)   # packed/padded ONCE, outside the jit

    batch = 200
    x = jax.random.normal(kx, (batch, N_FEATURES), dtype=jnp.float32)

    # tb=128 -> Bp=256, 2-step grid at this small demo batch: exercises the
    # pipelined, megacore-shardable path plus a ragged (padded) last tile.
    # For real workloads use the default tb=512.
    out = ae_big_2d_v2_forward(x, w_stack, b_stack, tb=128)
    out = jax.block_until_ready(out)

    ref = reference_forward(x, params)
    assert out.shape == (batch, N_FEATURES)
    # bf16 MXU inputs (f32 accumulation) vs an all-f32 reference: tolerance
    # loosened accordingly (per review, ~1e-2-level relative agreement expected).
    assert jnp.allclose(out, ref, atol=3e-2, rtol=3e-2), "mismatch vs reference"

    print("KERNEL_OK")
</pallas_src>

<mosaic_0001>
module attributes {stable_mosaic.version = 11 : i64} {
  func.func @_ae_kernel(%arg0: i32, %arg1: memref<8x128xf32, #tpu.memory_space<vmem>>, %arg2: memref<10x8x8xbf16, #tpu.memory_space<vmem>>, %arg3: memref<10x8x1xf32, #tpu.memory_space<vmem>>, %arg4: memref<4x128xf32, #tpu.memory_space<vmem>>) attributes {dimension_semantics = [#tpu.dimension_semantics<parallel>], iteration_bounds = array<i64: 2>, scalar_prefetch = 0 : i64, scratch_operands = 0 : i64, tpu.core_type = #tpu.core_type<tc>, window_params = [{transform_indices = @transform_0, window_bounds = array<i64: 8, 128>}, {pipeline_mode = #tpu.pipeline_mode<synchronous>, transform_indices = @transform_1, window_bounds = array<i64: 10, 8, 8>}, {pipeline_mode = #tpu.pipeline_mode<synchronous>, transform_indices = @transform_2, window_bounds = array<i64: 10, 8, 1>}, {transform_indices = @transform_3, window_bounds = array<i64: 4, 128>}]} {
    %c0 = arith.constant 0 : index
    %c0_0 = arith.constant 0 : index
    %0 = vector.load %arg1[%c0, %c0_0] : memref<8x128xf32, #tpu.memory_space<vmem>>, vector<8x128xf32>
    %c0_1 = arith.constant 0 : index
    %c0_2 = arith.constant 0 : index
    %c0_3 = arith.constant 0 : index
    %1 = vector.load %arg2[%c0_1, %c0_2, %c0_3] : memref<10x8x8xbf16, #tpu.memory_space<vmem>>, vector<1x8x8xbf16>
    %2 = vector.shape_cast %1 : vector<1x8x8xbf16> to vector<8x8xbf16>
    %3 = arith.truncf %0 : vector<8x128xf32> to vector<8x128xbf16>
    %cst = arith.constant dense<0.000000e+00> : vector<8x128xf32>
    %4 = tpu.matmul %2, %3, %cst {dimension_numbers = #tpu.dot_dimension_numbers<[1], [0], [0], [1], [0, 0, 1, 1], [], []>} : vector<8x8xbf16>, vector<8x128xbf16>, vector<8x128xf32> -> vector<8x128xf32>
    %c0_4 = arith.constant 0 : index
    %c0_5 = arith.constant 0 : index
    %c0_6 = arith.constant 0 : index
    %5 = vector.load %arg3[%c0_4, %c0_5, %c0_6] : memref<10x8x1xf32, #tpu.memory_space<vmem>>, vector<1x8x1xf32>
    %6 = vector.shape_cast %5 : vector<1x8x1xf32> to vector<8x1xf32>
    %7 = vector.broadcast %6 : vector<8x1xf32> to vector<8x128xf32>
    %8 = arith.addf %4, %7 : vector<8x128xf32>
    %9 = math.tanh %8 : vector<8x128xf32>
    %c1 = arith.constant 1 : index
    %c0_7 = arith.constant 0 : index
    %c0_8 = arith.constant 0 : index
    %10 = vector.load %arg2[%c1, %c0_7, %c0_8] : memref<10x8x8xbf16, #tpu.memory_space<vmem>>, vector<1x8x8xbf16>
    %11 = vector.shape_cast %10 : vector<1x8x8xbf16> to vector<8x8xbf16>
    %12 = arith.truncf %9 : vector<8x128xf32> to vector<8x128xbf16>
    %cst_9 = arith.constant dense<0.000000e+00> : vector<8x128xf32>
    %13 = tpu.matmul %11, %12, %cst_9 {dimension_numbers = #tpu.dot_dimension_numbers<[1], [0], [0], [1], [0, 0, 1, 1], [], []>} : vector<8x8xbf16>, vector<8x128xbf16>, vector<8x128xf32> -> vector<8x128xf32>
    %c1_10 = arith.constant 1 : index
    %c0_11 = arith.constant 0 : index
    %c0_12 = arith.constant 0 : index
    %14 = vector.load %arg3[%c1_10, %c0_11, %c0_12] : memref<10x8x1xf32, #tpu.memory_space<vmem>>, vector<1x8x1xf32>
    %15 = vector.shape_cast %14 : vector<1x8x1xf32> to vector<8x1xf32>
    %16 = vector.broadcast %15 : vector<8x1xf32> to vector<8x128xf32>
    %17 = arith.addf %13, %16 : vector<8x128xf32>
    %18 = math.tanh %17 : vector<8x128xf32>
    %c2 = arith.constant 2 : index
    %c0_13 = arith.constant 0 : index
    %c0_14 = arith.constant 0 : index
    %19 = vector.load %arg2[%c2, %c0_13, %c0_14] : memref<10x8x8xbf16, #tpu.memory_space<vmem>>, vector<1x8x8xbf16>
    %20 = vector.shape_cast %19 : vector<1x8x8xbf16> to vector<8x8xbf16>
    %21 = arith.truncf %18 : vector<8x128xf32> to vector<8x128xbf16>
    %cst_15 = arith.constant dense<0.000000e+00> : vector<8x128xf32>
    %22 = tpu.matmul %20, %21, %cst_15 {dimension_numbers = #tpu.dot_dimension_numbers<[1], [0], [0], [1], [0, 0, 1, 1], [], []>} : vector<8x8xbf16>, vector<8x128xbf16>, vector<8x128xf32> -> vector<8x128xf32>
    %c2_16 = arith.constant 2 : index
    %c0_17 = arith.constant 0 : index
    %c0_18 = arith.constant 0 : index
    %23 = vector.load %arg3[%c2_16, %c0_17, %c0_18] : memref<10x8x1xf32, #tpu.memory_space<vmem>>, vector<1x8x1xf32>
    %24 = vector.shape_cast %23 : vector<1x8x1xf32> to vector<8x1xf32>
    %25 = vector.broadcast %24 : vector<8x1xf32> to vector<8x128xf32>
    %26 = arith.addf %22, %25 : vector<8x128xf32>
    %27 = math.tanh %26 : vector<8x128xf32>
    %c3 = arith.constant 3 : index
    %c0_19 = arith.constant 0 : index
    %c0_20 = arith.constant 0 : index
    %28 = vector.load %arg2[%c3, %c0_19, %c0_20] : memref<10x8x8xbf16, #tpu.memory_space<vmem>>, vector<1x8x8xbf16>
    %29 = vector.shape_cast %28 : vector<1x8x8xbf16> to vector<8x8xbf16>
    %30 = arith.truncf %27 : vector<8x128xf32> to vector<8x128xbf16>
    %cst_21 = arith.constant dense<0.000000e+00> : vector<8x128xf32>
    %31 = tpu.matmul %29, %30, %cst_21 {dimension_numbers = #tpu.dot_dimension_numbers<[1], [0], [0], [1], [0, 0, 1, 1], [], []>} : vector<8x8xbf16>, vector<8x128xbf16>, vector<8x128xf32> -> vector<8x128xf32>
    %c3_22 = arith.constant 3 : index
    %c0_23 = arith.constant 0 : index
    %c0_24 = arith.constant 0 : index
    %32 = vector.load %arg3[%c3_22, %c0_23, %c0_24] : memref<10x8x1xf32, #tpu.memory_space<vmem>>, vector<1x8x1xf32>
    %33 = vector.shape_cast %32 : vector<1x8x1xf32> to vector<8x1xf32>
    %34 = vector.broadcast %33 : vector<8x1xf32> to vector<8x128xf32>
    %35 = arith.addf %31, %34 : vector<8x128xf32>
    %36 = math.tanh %35 : vector<8x128xf32>
    %c4 = arith.constant 4 : index
    %c0_25 = arith.constant 0 : index
    %c0_26 = arith.constant 0 : index
    %37 = vector.load %arg2[%c4, %c0_25, %c0_26] : memref<10x8x8xbf16, #tpu.memory_space<vmem>>, vector<1x8x8xbf16>
    %38 = vector.shape_cast %37 : vector<1x8x8xbf16> to vector<8x8xbf16>
    %39 = arith.truncf %36 : vector<8x128xf32> to vector<8x128xbf16>
    %cst_27 = arith.constant dense<0.000000e+00> : vector<8x128xf32>
    %40 = tpu.matmul %38, %39, %cst_27 {dimension_numbers = #tpu.dot_dimension_numbers<[1], [0], [0], [1], [0, 0, 1, 1], [], []>} : vector<8x8xbf16>, vector<8x128xbf16>, vector<8x128xf32> -> vector<8x128xf32>
    %c4_28 = arith.constant 4 : index
    %c0_29 = arith.constant 0 : index
    %c0_30 = arith.constant 0 : index
    %41 = vector.load %arg3[%c4_28, %c0_29, %c0_30] : memref<10x8x1xf32, #tpu.memory_space<vmem>>, vector<1x8x1xf32>
    %42 = vector.shape_cast %41 : vector<1x8x1xf32> to vector<8x1xf32>
    %43 = vector.broadcast %42 : vector<8x1xf32> to vector<8x128xf32>
    %44 = arith.addf %40, %43 : vector<8x128xf32>
    %45 = math.tanh %44 : vector<8x128xf32>
    %c5 = arith.constant 5 : index
    %c0_31 = arith.constant 0 : index
    %c0_32 = arith.constant 0 : index
    %46 = vector.load %arg2[%c5, %c0_31, %c0_32] : memref<10x8x8xbf16, #tpu.memory_space<vmem>>, vector<1x8x8xbf16>
    %47 = vector.shape_cast %46 : vector<1x8x8xbf16> to vector<8x8xbf16>
    %48 = arith.truncf %45 : vector<8x128xf32> to vector<8x128xbf16>
    %cst_33 = arith.constant dense<0.000000e+00> : vector<8x128xf32>
    %49 = tpu.matmul %47, %48, %cst_33 {dimension_numbers = #tpu.dot_dimension_numbers<[1], [0], [0], [1], [0, 0, 1, 1], [], []>} : vector<8x8xbf16>, vector<8x128xbf16>, vector<8x128xf32> -> vector<8x128xf32>
    %c5_34 = arith.constant 5 : index
    %c0_35 = arith.constant 0 : index
    %c0_36 = arith.constant 0 : index
    %50 = vector.load %arg3[%c5_34, %c0_35, %c0_36] : memref<10x8x1xf32, #tpu.memory_space<vmem>>, vector<1x8x1xf32>
    %51 = vector.shape_cast %50 : vector<1x8x1xf32> to vector<8x1xf32>
    %52 = vector.broadcast %51 : vector<8x1xf32> to vector<8x128xf32>
    %53 = arith.addf %49, %52 : vector<8x128xf32>
    %54 = math.tanh %53 : vector<8x128xf32>
    %c6 = arith.constant 6 : index
    %c0_37 = arith.constant 0 : index
    %c0_38 = arith.constant 0 : index
    %55 = vector.load %arg2[%c6, %c0_37, %c0_38] : memref<10x8x8xbf16, #tpu.memory_space<vmem>>, vector<1x8x8xbf16>
    %56 = vector.shape_cast %55 : vector<1x8x8xbf16> to vector<8x8xbf16>
    %57 = arith.truncf %54 : vector<8x128xf32> to vector<8x128xbf16>
    %cst_39 = arith.constant dense<0.000000e+00> : vector<8x128xf32>
    %58 = tpu.matmul %56, %57, %cst_39 {dimension_numbers = #tpu.dot_dimension_numbers<[1], [0], [0], [1], [0, 0, 1, 1], [], []>} : vector<8x8xbf16>, vector<8x128xbf16>, vector<8x128xf32> -> vector<8x128xf32>
    %c6_40 = arith.constant 6 : index
    %c0_41 = arith.constant 0 : index
    %c0_42 = arith.constant 0 : index
    %59 = vector.load %arg3[%c6_40, %c0_41, %c0_42] : memref<10x8x1xf32, #tpu.memory_space<vmem>>, vector<1x8x1xf32>
    %60 = vector.shape_cast %59 : vector<1x8x1xf32> to vector<8x1xf32>
    %61 = vector.broadcast %60 : vector<8x1xf32> to vector<8x128xf32>
    %62 = arith.addf %58, %61 : vector<8x128xf32>
    %63 = math.tanh %62 : vector<8x128xf32>
    %c7 = arith.constant 7 : index
    %c0_43 = arith.constant 0 : index
    %c0_44 = arith.constant 0 : index
    %64 = vector.load %arg2[%c7, %c0_43, %c0_44] : memref<10x8x8xbf16, #tpu.memory_space<vmem>>, vector<1x8x8xbf16>
    %65 = vector.shape_cast %64 : vector<1x8x8xbf16> to vector<8x8xbf16>
    %66 = arith.truncf %63 : vector<8x128xf32> to vector<8x128xbf16>
    %cst_45 = arith.constant dense<0.000000e+00> : vector<8x128xf32>
    %67 = tpu.matmul %65, %66, %cst_45 {dimension_numbers = #tpu.dot_dimension_numbers<[1], [0], [0], [1], [0, 0, 1, 1], [], []>} : vector<8x8xbf16>, vector<8x128xbf16>, vector<8x128xf32> -> vector<8x128xf32>
    %c7_46 = arith.constant 7 : index
    %c0_47 = arith.constant 0 : index
    %c0_48 = arith.constant 0 : index
    %68 = vector.load %arg3[%c7_46, %c0_47, %c0_48] : memref<10x8x1xf32, #tpu.memory_space<vmem>>, vector<1x8x1xf32>
    %69 = vector.shape_cast %68 : vector<1x8x1xf32> to vector<8x1xf32>
    %70 = vector.broadcast %69 : vector<8x1xf32> to vector<8x128xf32>
    %71 = arith.addf %67, %70 : vector<8x128xf32>
    %72 = math.tanh %71 : vector<8x128xf32>
    %c8 = arith.constant 8 : index
    %c0_49 = arith.constant 0 : index
    %c0_50 = arith.constant 0 : index
    %73 = vector.load %arg2[%c8, %c0_49, %c0_50] : memref<10x8x8xbf16, #tpu.memory_space<vmem>>, vector<1x8x8xbf16>
    %74 = vector.shape_cast %73 : vector<1x8x8xbf16> to vector<8x8xbf16>
    %75 = arith.truncf %72 : vector<8x128xf32> to vector<8x128xbf16>
    %cst_51 = arith.constant dense<0.000000e+00> : vector<8x128xf32>
    %76 = tpu.matmul %74, %75, %cst_51 {dimension_numbers = #tpu.dot_dimension_numbers<[1], [0], [0], [1], [0, 0, 1, 1], [], []>} : vector<8x8xbf16>, vector<8x128xbf16>, vector<8x128xf32> -> vector<8x128xf32>
    %c8_52 = arith.constant 8 : index
    %c0_53 = arith.constant 0 : index
    %c0_54 = arith.constant 0 : index
    %77 = vector.load %arg3[%c8_52, %c0_53, %c0_54] : memref<10x8x1xf32, #tpu.memory_space<vmem>>, vector<1x8x1xf32>
    %78 = vector.shape_cast %77 : vector<1x8x1xf32> to vector<8x1xf32>
    %79 = vector.broadcast %78 : vector<8x1xf32> to vector<8x128xf32>
    %80 = arith.addf %76, %79 : vector<8x128xf32>
    %81 = math.tanh %80 : vector<8x128xf32>
    %c9 = arith.constant 9 : index
    %c0_55 = arith.constant 0 : index
    %c0_56 = arith.constant 0 : index
    %82 = vector.load %arg2[%c9, %c0_55, %c0_56] : memref<10x8x8xbf16, #tpu.memory_space<vmem>>, vector<1x8x8xbf16>
    %83 = vector.shape_cast %82 : vector<1x8x8xbf16> to vector<8x8xbf16>
    %84 = arith.truncf %81 : vector<8x128xf32> to vector<8x128xbf16>
    %cst_57 = arith.constant dense<0.000000e+00> : vector<8x128xf32>
    %85 = tpu.matmul %83, %84, %cst_57 {dimension_numbers = #tpu.dot_dimension_numbers<[1], [0], [0], [1], [0, 0, 1, 1], [], []>} : vector<8x8xbf16>, vector<8x128xbf16>, vector<8x128xf32> -> vector<8x128xf32>
    %c9_58 = arith.constant 9 : index
    %c0_59 = arith.constant 0 : index
    %c0_60 = arith.constant 0 : index
    %86 = vector.load %arg3[%c9_58, %c0_59, %c0_60] : memref<10x8x1xf32, #tpu.memory_space<vmem>>, vector<1x8x1xf32>
    %87 = vector.shape_cast %86 : vector<1x8x1xf32> to vector<8x1xf32>
    %88 = vector.broadcast %87 : vector<8x1xf32> to vector<8x128xf32>
    %89 = arith.addf %85, %88 : vector<8x128xf32>
    %90 = vector.extract_strided_slice %89 {offsets = [0, 0], sizes = [4, 128], strides = [1, 1]} : vector<8x128xf32> to vector<4x128xf32>
    %c0_61 = arith.constant 0 : index
    %c0_62 = arith.constant 0 : index
    %91 = vector.load %arg4[%c0_61, %c0_62] : memref<4x128xf32, #tpu.memory_space<vmem>>, vector<4x128xf32>
    tpu.vector_store %arg4[%c0_61, %c0_62], %90 {strides = array<i32>} : memref<4x128xf32, #tpu.memory_space<vmem>>, vector<4x128xf32>,
    return
  }
  func.func @transform_0(%arg0: i32) -> (i32, i32) {
    %c0_i32 = arith.constant 0 : i32
    %c0_i32_0 = arith.constant 0 : i32
    return %c0_i32, %arg0 : i32, i32
  }
  func.func @transform_1(%arg0: i32) -> (i32, i32, i32) {
    %c0_i32 = arith.constant 0 : i32
    %c0_i32_0 = arith.constant 0 : i32
    %c0_i32_1 = arith.constant 0 : i32
    %c0_i32_2 = arith.constant 0 : i32
    return %c0_i32, %c0_i32_0, %c0_i32_1 : i32, i32, i32
  }
  func.func @transform_2(%arg0: i32) -> (i32, i32, i32) {
    %c0_i32 = arith.constant 0 : i32
    %c0_i32_0 = arith.constant 0 : i32
    %c0_i32_1 = arith.constant 0 : i32
    %c0_i32_2 = arith.constant 0 : i32
    return %c0_i32, %c0_i32_0, %c0_i32_1 : i32, i32, i32
  }
  func.func @transform_3(%arg0: i32) -> (i32, i32) {
    %c0_i32 = arith.constant 0 : i32
    %c0_i32_0 = arith.constant 0 : i32
    return %c0_i32, %arg0 : i32, i32
  }
}

</mosaic_0001>

<bundles_post_ra>
// kernel: ae_big_2d_v2_forward.1
= control target key start
LH: loop header
LB: loop body
LE: loop exit
PB: predicated region body
PF: predicated region fallthrough
CT: control target
= control target key end

     0   :  { %s970_s12 = smov 0   ;;  %s1101_s0 = inlined_call_operand.vmem [shape: f32[8,256], index: 0, kind: input, shape index: {}]   ;;  %s1102_s1 = inlined_call_operand.vmem [shape: bf16[10,8,8], index: 1, kind: input, shape index: {}]   ;;  %s1103_s2 = inlined_call_operand.vmem [shape: f32[10,8,1], index: 2, kind: input, shape index: {}]   ;;  %s1104_s3 = inlined_call_operand.vmem [shape: f32[4,256], index: 3, kind: output, shape index: {}]  }
   0x1 LB: > { %s791_s13 = sadd.s32 4294967295, %s945_s12   ;;  %p795_p0 = scmp.ge.s32.totalorder %s945_s12, 1  ;;  %s945_s12 = sphi %s970_s12, %s13_s12  }
   0x2   : > { %p136_p1 = scmp.lt.s32.totalorder %s945_s12, 3 }
   0x4   : > { %p137_p2 = pnand %p795_p0, %p136_p1 }
   0x5   : > { %p158_p3 = scmp.lt.s32.totalorder (!%p137_p2), %s791_s13, 1 }
   0x6   : > { %140 = sbr.rel (%p137_p2) target bundleno = 2155 (0x86b), region = 32 }
   0xb   : > { %v947_v0 = vmov 0.0   ;;  %vm948_vm0 = vmmov 0   ;;  %v170_v1 = vld [vmem:[%s1103_s2] sm:$0xff]  ;;  %s1106_s13 = smov (!%p158_p3, %s791_s13), 1  ;;  %v949_v2 = vmov 0   ;;  %v800_v3 = vld [vmem:[%s1103_s2 + $0x8] sm:$0xff] }
   0xc   : > { %848 = vmatprep.subr.bf16.mxu0 %v947_v0  ;;  %850 = vmatprep.mubr.msk.bf16.mxu0 %vm948_vm0, %v947_v0  ;;  %s796_s16 = sshll.u32 %s1106_s13, 3  ;;  %vm180_vm1 = vcmask 1043456   ;;  %v809_v6 = vld [vmem:[%s1103_s2 + $0x20] sm:$0xff]  ;;  %vm176_vm2 = vcmask 64512   ;;  %v815_v9 = vld [vmem:[%s1103_s2 + $0x30] sm:$0xff]  ;;  %v806_v22 = vld [vmem:[%s1103_s2 + $0x18] sm:$0xff] }
   0xd   : > { %919 = vset.pattern.permute.xlu0 %v949_v2  ;;  %854 = vmatprep.subr.bf16.mxu1 %v947_v0  ;;  %s161_s21 = scalar_lea.vmem %s1101_s0, %s796_s16  ;;  %v168_v8 = vld [vmem:[%s1102_s1] sm:$0xf]  ;;  %v799_v20 = vld [vmem:[%s1102_s1 + $0x4] sm:$0xf]  ;;  %v803_v21 = vld [vmem:[%s1103_s2 + $0x10] sm:$0xff]  ;;  %s797_s6 = sshll.u32 %s1106_s13, 2 }
   0xe   : > { %173 = vperm.xlu0 %919, %v170_v1   ;;  %856 = vmatprep.mubr.msk.bf16.mxu1 %vm948_vm0, %v947_v0  ;;  %v167_v4 = vld [vmem:[%s161_s21] sm:$0xff]  ;;  %v812_v23 = vld [vmem:[%s1103_s2 + $0x28] sm:$0xff]  ;;  %v818_v24 = vld [vmem:[%s1103_s2 + $0x38] sm:$0xff]  ;;  %s165_s9 = scalar_lea.vmem %s1104_s3, %s797_s6 }
   0xf   : > { %920 = vset.pattern.permute.xlu1 %v949_v2  ;;  %v169_v5 = vpack.c.bf16 %v167_v4, %v167_v4  ;;  %v821_v10 = vld [vmem:[%s1103_s2 + $0x40] sm:$0xff]  ;;  %v824_v25 = vld [vmem:[%s1103_s2 + $0x48] sm:$0xff]  ;;  %v808_v55 = vld [vmem:[%s1102_s1 + $0x10] sm:$0xf] }
  0x10   : > { %289 = vperm.xlu1 %920, %v803_v21   ;;  %v802_v35 = vld [vmem:[%s1102_s1 + $0x8] sm:$0xf]  ;;  %v805_v45 = vld [vmem:[%s1102_s1 + $0xc] sm:$0xf]  ;;  %v811_v2 = vld [vmem:[%s1102_s1 + $0x14] sm:$0xf] }
  0x11   : > { %v182_v7 = vsel %vm180_vm1, %v169_v5, 0 }
  0x12   : > { %232 = vperm.xlu0 %919, %v800_v3   ;;  %849 = vmatpush3.bf16.msra.mxu0 %v182_v7 }
  0x13   : > { %860 = vmatprep.subr.bf16.mxu0 %v947_v0 }
  0x14   : > { %346 = vperm.xlu1 %920, %v806_v22   ;;  %v817_v22 = vld [vmem:[%s1102_s1 + $0x1c] sm:$0xf] }
  0x15   : > { %851 = vmatmul.mubr.msk.bf16.vlgmr.msra.gmra.mxu0 %vm176_vm2, %v168_v8 }
  0x16   : > { %403 = vperm.xlu0 %919, %v809_v6   ;;  %862 = vmatprep.mubr.msk.bf16.mxu0 %vm948_vm0, %v947_v0 }
  0x18   : > { %460 = vperm.xlu1 %920, %v812_v23  }
  0x1a   : > { %517 = vperm.xlu0 %919, %v815_v9  }
  0x1c   : > { %574 = vperm.xlu1 %920, %v818_v24  }
  0x1e   : > { %631 = vperm.xlu0 %919, %v821_v10  }
  0x20   : > { %688 = vperm.xlu1 %920, %v824_v25  }
  0x89   : > { %v174_v11 = vpop.permute.xlu0 %173 }
  0x8b   : > { %v290_v36 = vpop.permute.xlu1 %289 }
  0x8d   : > { %v233_v26 = vpop.permute.xlu0 %232 }
  0x8f   : > { %v347_v46 = vpop.permute.xlu1 %346 }
  0x91   : > { %v404_v56 = vpop.permute.xlu0 %403 }
  0x93   : > { %v461_v3 = vpop.permute.xlu1 %460 }
  0x97   : > { %v575_v23 = vpop.permute.xlu1 %574 }
  0xd5   : > { %v218_v12 = vpop.f32.mrf.mxu0 }
  0xd6   : > { %v219_v13 = vadd.f32 %v218_v12, %v174_v11  ;;  %v814_v12 = vld [vmem:[%s1102_s1 + $0x18] sm:$0xf] }
  0xd7   : > { %v852_v14 = vpop.f32.mrf.mxu0 }
  0xd8   : > { %921 = vtanh.f32 %v219_v13  ;;  %v518_v13 = vpop.permute.xlu0 %517 }
  0xd9   : > { %v221_v15 = vpop.f32.mrf.mxu0 }
  0xdb   : > { %v853_v16 = vpop.f32.mrf.mxu0 }
  0xe5   : > { %v922_v17 = vpop.eup %921 }
  0xe6   : > { %v227_v18 = vpack.c.bf16 %v922_v17, %v922_v17 }
  0xe8   : > { %v239_v19 = vsel %vm180_vm1, %v227_v18, 0 }
  0xe9   : > { %855 = vmatpush3.bf16.msra.mxu1 %v239_v19 }
  0xea   : > { %866 = vmatprep.subr.bf16.mxu1 %v947_v0 }
  0xec   : > { %857 = vmatmul.mubr.msk.bf16.vlgmr.msra.gmra.mxu1 %vm176_vm2, %v799_v20 }
  0xed   : > { %868 = vmatprep.mubr.msk.bf16.mxu1 %vm948_vm0, %v947_v0 }
 0x1ac   : > { %v275_v27 = vpop.f32.mrf.mxu1 }
 0x1ad   : > { %v276_v28 = vadd.f32 %v275_v27, %v233_v26 }
 0x1ae   : > { %v858_v29 = vpop.f32.mrf.mxu1 }
 0x1af   : > { %923 = vtanh.f32 %v276_v28 }
 0x1b0   : > { %v278_v30 = vpop.f32.mrf.mxu1 }
 0x1b2   : > { %v859_v31 = vpop.f32.mrf.mxu1 }
 0x1bc   : > { %v924_v32 = vpop.eup %923 }
 0x1bd   : > { %v284_v33 = vpack.c.bf16 %v924_v32, %v924_v32  ;;  %v820_v32 = vld [vmem:[%s1102_s1 + $0x20] sm:$0xf] }
 0x1bf   : > { %v296_v34 = vsel %vm180_vm1, %v284_v33, 0 }
 0x1c0   : > { %861 = vmatpush3.bf16.msra.mxu0 %v296_v34 }
 0x1c1   : > { %872 = vmatprep.subr.bf16.mxu0 %v947_v0 }
 0x1c3   : > { %863 = vmatmul.mubr.msk.bf16.vlgmr.msra.gmra.mxu0 %vm176_vm2, %v802_v35 }
 0x1c4   : > { %874 = vmatprep.mubr.msk.bf16.mxu0 %vm948_vm0, %v947_v0 }
 0x283   : > { %v332_v37 = vpop.f32.mrf.mxu0 }
 0x284   : > { %v333_v38 = vadd.f32 %v332_v37, %v290_v36 }
 0x285   : > { %v864_v39 = vpop.f32.mrf.mxu0 }
 0x286   : > { %925 = vtanh.f32 %v333_v38 }
 0x287   : > { %v335_v40 = vpop.f32.mrf.mxu0 }
 0x289   : > { %v865_v41 = vpop.f32.mrf.mxu0 }
 0x28a   : > { %v823_v41 = vld [vmem:[%s1102_s1 + $0x24] sm:$0xf] }
 0x293   : > { %v926_v42 = vpop.eup %925 }
 0x294   : > { %v341_v43 = vpack.c.bf16 %v926_v42, %v926_v42  ;;  %v689_v42 = vpop.permute.xlu1 %688 }
 0x296   : > { %v353_v44 = vsel %vm180_vm1, %v341_v43, 0 }
 0x297   : > { %867 = vmatpush3.bf16.msra.mxu1 %v353_v44 }
 0x298   : > { %878 = vmatprep.subr.bf16.mxu1 %v947_v0 }
 0x29a   : > { %869 = vmatmul.mubr.msk.bf16.vlgmr.msra.gmra.mxu1 %vm176_vm2, %v805_v45 }
 0x29b   : > { %880 = vmatprep.mubr.msk.bf16.mxu1 %vm948_vm0, %v947_v0 }
 0x35a   : > { %v389_v47 = vpop.f32.mrf.mxu1 }
 0x35b   : > { %v390_v48 = vadd.f32 %v389_v47, %v347_v46 }
 0x35c   : > { %v870_v49 = vpop.f32.mrf.mxu1 }
 0x35d   : > { %927 = vtanh.f32 %v390_v48 }
 0x35e   : > { %v392_v50 = vpop.f32.mrf.mxu1 }
 0x360   : > { %v871_v51 = vpop.f32.mrf.mxu1 }
 0x36a   : > { %v928_v52 = vpop.eup %927 }
 0x36b   : > { %v398_v53 = vpack.c.bf16 %v928_v52, %v928_v52 }
 0x36d   : > { %v410_v54 = vsel %vm180_vm1, %v398_v53, 0 }
 0x36e   : > { %873 = vmatpush3.bf16.msra.mxu0 %v410_v54 }
 0x36f   : > { %884 = vmatprep.subr.bf16.mxu0 %v947_v0 }
 0x371   : > { %875 = vmatmul.mubr.msk.bf16.vlgmr.msra.gmra.mxu0 %vm176_vm2, %v808_v55 }
 0x372   : > { %886 = vmatprep.mubr.msk.bf16.mxu0 %vm948_vm0, %v947_v0 }
 0x431   : > { %v446_v57 = vpop.f32.mrf.mxu0 }
 0x432   : > { %v447_v58 = vadd.f32 %v446_v57, %v404_v56 }
 0x433   : > { %v876_v59 = vpop.f32.mrf.mxu0 }
 0x434   : > { %929 = vtanh.f32 %v447_v58 }
 0x435   : > { %v449_v60 = vpop.f32.mrf.mxu0 }
 0x437   : > { %v877_v61 = vpop.f32.mrf.mxu0 }
 0x441   : > { %v930_v62 = vpop.eup %929 }
 0x442   : > { %v455_v63 = vpack.c.bf16 %v930_v62, %v930_v62 }
 0x444   : > { %v467_v1 = vsel %vm180_vm1, %v455_v63, 0 }
 0x445   : > { %879 = vmatpush3.bf16.msra.mxu1 %v467_v1 }
 0x446   : > { %890 = vmatprep.subr.bf16.mxu1 %v947_v0 }
 0x448   : > { %881 = vmatmul.mubr.msk.bf16.vlgmr.msra.gmra.mxu1 %vm176_vm2, %v811_v2 }
 0x449   : > { %892 = vmatprep.mubr.msk.bf16.mxu1 %vm948_vm0, %v947_v0 }
 0x508   : > { %v503_v4 = vpop.f32.mrf.mxu1 }
 0x509   : > { %v504_v5 = vadd.f32 %v503_v4, %v461_v3 }
 0x50a   : > { %v882_v6 = vpop.f32.mrf.mxu1 }
 0x50b   : > { %931 = vtanh.f32 %v504_v5 }
 0x50c   : > { %v506_v7 = vpop.f32.mrf.mxu1 }
 0x50e   : > { %v883_v8 = vpop.f32.mrf.mxu1 }
 0x518   : > { %v932_v9 = vpop.eup %931 }
 0x519   : > { %v512_v10 = vpack.c.bf16 %v932_v9, %v932_v9 }
 0x51b   : > { %v524_v11 = vsel %vm180_vm1, %v512_v10, 0 }
 0x51c   : > { %885 = vmatpush3.bf16.msra.mxu0 %v524_v11 }
 0x51d   : > { %896 = vmatprep.subr.bf16.mxu0 %v947_v0 }
 0x51f   : > { %887 = vmatmul.mubr.msk.bf16.vlgmr.msra.gmra.mxu0 %vm176_vm2, %v814_v12 }
 0x520   : > { %898 = vmatprep.mubr.msk.bf16.mxu0 %vm948_vm0, %v947_v0 }
 0x5df   : > { %v560_v14 = vpop.f32.mrf.mxu0 }
 0x5e0   : > { %v561_v15 = vadd.f32 %v560_v14, %v518_v13 }
 0x5e1   : > { %v888_v16 = vpop.f32.mrf.mxu0 }
 0x5e2   : > { %933 = vtanh.f32 %v561_v15 }
 0x5e3   : > { %v563_v17 = vpop.f32.mrf.mxu0 }
 0x5e5   : > { %v889_v18 = vpop.f32.mrf.mxu0 }
 0x5ef   : > { %v934_v19 = vpop.eup %933 }
 0x5f0   : > { %v569_v20 = vpack.c.bf16 %v934_v19, %v934_v19 }
 0x5f2   : > { %v581_v21 = vsel %vm180_vm1, %v569_v20, 0 }
 0x5f3   : > { %891 = vmatpush3.bf16.msra.mxu1 %v581_v21 }
 0x5f4   : > { %902 = vmatprep.subr.bf16.mxu1 %v947_v0 }
 0x5f6   : > { %893 = vmatmul.mubr.msk.bf16.vlgmr.msra.gmra.mxu1 %vm176_vm2, %v817_v22 }
 0x5f7   : > { %904 = vmatprep.mubr.msk.bf16.mxu1 %vm948_vm0, %v947_v0  ;;  %v632_v0 = vpop.permute.xlu0 %631 }
 0x6b6   : > { %v617_v24 = vpop.f32.mrf.mxu1 }
 0x6b7   : > { %v618_v25 = vadd.f32 %v617_v24, %v575_v23 }
 0x6b8   : > { %v894_v26 = vpop.f32.mrf.mxu1 }
 0x6b9   : > { %935 = vtanh.f32 %v618_v25 }
 0x6ba   : > { %v620_v27 = vpop.f32.mrf.mxu1 }
 0x6bc   : > { %v895_v28 = vpop.f32.mrf.mxu1 }
 0x6c6   : > { %v936_v29 = vpop.eup %935 }
 0x6c7   : > { %v626_v30 = vpack.c.bf16 %v936_v29, %v936_v29 }
 0x6c9   : > { %v638_v31 = vsel %vm180_vm1, %v626_v30, 0 }
 0x6ca   : > { %897 = vmatpush3.bf16.msra.mxu0 %v638_v31 }
 0x6cd   : > { %899 = vmatmul.mubr.msk.bf16.vlgmr.msra.gmra.mxu0 %vm176_vm2, %v820_v32 }
 0x78d   : > { %v674_v33 = vpop.f32.mrf.mxu0 }
 0x78e   : > { %v675_v34 = vadd.f32 %v674_v33, %v632_v0 }
 0x78f   : > { %v900_v35 = vpop.f32.mrf.mxu0 }
 0x790   : > { %937 = vtanh.f32 %v675_v34 }
 0x791   : > { %v677_v36 = vpop.f32.mrf.mxu0 }
 0x793   : > { %v901_v37 = vpop.f32.mrf.mxu0 }
 0x79d   : > { %v938_v38 = vpop.eup %937 }
 0x79e   : > { %v683_v39 = vpack.c.bf16 %v938_v38, %v938_v38 }
 0x7a0   : > { %v695_v40 = vsel %vm180_vm1, %v683_v39, 0 }
 0x7a1   : > { %903 = vmatpush3.bf16.msra.mxu1 %v695_v40 }
 0x7a4   : > { %905 = vmatmul.mubr.msk.bf16.vlgmr.msra.gmra.mxu1 %vm176_vm2, %v823_v41 }
 0x864   : > { %v731_v43 = vpop.f32.mrf.mxu1 }
 0x865   : > { %v732_v44 = vadd.f32 %v731_v43, %v689_v42 }
 0x866   : > { %v906_v45 = vpop.f32.mrf.mxu1 }
 0x867   : > { %737 = vst [vmem:[%s165_s9] sm:$0xf] %v732_v44 }
 0x868   : > { %v734_v46 = vpop.f32.mrf.mxu1 }
 0x86a   : > { %v907_v47 = vpop.f32.mrf.mxu1 }
 0x86b PF: > { %s13_s12 = sadd.s32 1, %s945_s12  }
 0x86c   : > { %p10_p4 = scmp.ge.s32.totalorder %s13_s12, 4  }
 0x86e   :  { %12 = sbr.rel (!%p10_p4) target bundleno = 1 (0x1), region = 80 }

</bundles_post_ra>
